<compile_context>
chip_gen: v5e
topology: v5e:2x2
jax: 0.10.0
libtpu: 0.0.40
codegen_flags: <defaults>
</compile_context>

<pallas_src>
import jax
import jax.numpy as jnp
from jax import lax
from jax.experimental import pallas as pl
from jax.experimental.pallas import tpu as pltpu


def _round_up(x: int, m: int) -> int:
    return (x + m - 1) // m * m


def make_rnn_kernel(num_layers: int, seq_len: int, hoist_whh: bool, unroll):
    """Kernel closed over static num_layers / seq_len / loop policy.

    Ref order:
      inputs : x (T, B_blk, IN_pad), then per layer (w_ih_T, w_hh_T, bias),
               then fc_w_T, fc_b
      outputs: out (B_blk, C_pad)
      scratch: gates_buf (T, B_blk, H_pad) -- holds the hoisted input projection
               for the current layer, then is overwritten in place with that
               layer's hidden sequence (input to the next layer).
    """

    def kernel(*refs):
        x_ref = refs[0]
        idx = 1
        layers = []
        for _ in range(num_layers):
            layers.append(refs[idx:idx + 3])  # (w_ih_T, w_hh_T, bias)
            idx += 3
        fc_w_t_ref, fc_b_ref, out_ref, gates_buf = refs[idx:idx + 4]

        T, B_blk, _ = x_ref.shape
        H_pad = gates_buf.shape[-1]

        h = None
        for layer_idx, (w_ih_t, w_hh_t, bias) in enumerate(layers):
            # ---- hoisted input projection: one big MXU matmul over all timesteps.
            if layer_idx == 0:
                x_seq = x_ref[...]          # (T, B_blk, IN_pad)
            else:
                x_seq = gates_buf[...]      # previous layer's hidden sequence (in place)
            in_dim = x_seq.shape[-1]
            gates = (
                jnp.dot(x_seq.reshape(T * B_blk, in_dim), w_ih_t[...],
                        preferred_element_type=jnp.float32)
                + bias[...]                 # (1, H_pad) broadcast (b_ih + b_hh folded on host)
            )
            gates_buf[...] = gates.reshape(T, B_blk, H_pad).astype(gates_buf.dtype)

            # ---- serial recurrence: only h @ W_hh^T + tanh per step.
            write_seq = layer_idx < num_layers - 1   # last layer: only final h needed
            w_hh_val = w_hh_t[...] if hoist_whh else None

            def step(t, h_prev, _write=write_seq, _w=w_hh_val, _w_ref=w_hh_t):
                w = _w if _w is not None else _w_ref[...]
                h_new = jnp.tanh(
                    gates_buf[t].astype(jnp.float32)
                    + jnp.dot(h_prev.astype(w.dtype), w,
                              preferred_element_type=jnp.float32)
                )
                if _write:
                    gates_buf[t] = h_new.astype(gates_buf.dtype)
                return h_new

            h = lax.fori_loop(0, seq_len, step,
                              jnp.zeros((B_blk, H_pad), jnp.float32),
                              unroll=unroll)

        # out[:, -1, :] of the last RNN layer is exactly the final `h`; apply fc.
        out_ref[...] = (
            jnp.dot(h.astype(fc_w_t_ref.dtype), fc_w_t_ref[...],
                    preferred_element_type=jnp.float32)
            + fc_b_ref[...]
        ).astype(out_ref.dtype)

    return kernel


def rnn_model_forward(x, layer_params, fc_w, fc_b, *, b_blk=None,
                      mxu_dtype=jnp.bfloat16):
    """x: (B, T, input_size) f32.  layer_params: list of (w_ih, w_hh, b_ih, b_hh)
    in PyTorch convention (w_ih: (H, in), w_hh: (H, H), biases: (H,)).

    mxu_dtype: dtype of MXU operands / activation scratch (bf16 default for
    v6e/v7x throughput + halved DMA; use jnp.float32 for exact f32 math)."""
    B, T, IN = x.shape
    H = layer_params[0][1].shape[0]
    C = fc_w.shape[0]

    H_pad = _round_up(H, 128)
    IN_pad = _round_up(IN, 128)
    C_pad = _round_up(C, 128)

    mxu_bytes = jnp.dtype(mxu_dtype).itemsize

    # --- generation-aware VMEM budget (v5e/v6e: 128 MiB phys, v7x: 64 MiB).
    try:
        vmem_cap = int(pltpu.get_tpu_info().vmem_capacity_bytes)
    except Exception:
        vmem_cap = 64 * 1024 * 1024  # conservative (v7x) fallback
    vmem_budget = int(vmem_cap * 0.8)

    # Constant (per-grid-step-invariant) operands; auto pipeline double-buffers them.
    weight_bytes = 0
    in_dim = IN_pad
    for _ in layer_params:
        weight_bytes += (in_dim * H_pad + H_pad * H_pad) * mxu_bytes + H_pad * 4
        in_dim = H_pad
    weight_bytes += H_pad * C_pad * mxu_bytes + C_pad * 4
    weight_bytes *= 2

    def block_bytes(bb):
        x_bytes = 2 * T * bb * IN_pad * mxu_bytes     # double-buffered x block
        gate_bytes = T * bb * H_pad * mxu_bytes       # single scratch buffer
        out_bytes = 2 * bb * C_pad * 4
        live_vals = 2 * T * bb * H_pad * 4            # headroom for x_seq / gates values
        return x_bytes + gate_bytes + out_bytes + live_vals

    B_pad8 = _round_up(B, 8)
    if b_blk is None:
        cand = min(256, B_pad8)
        if B_pad8 >= 16:
            # v7x: make sure the grid has >= 2 blocks so both TensorCores get work.
            cand = min(cand, _round_up(pl.cdiv(B_pad8, 2), 8))
        while cand > 8 and weight_bytes + block_bytes(cand) > vmem_budget:
            cand -= 8
        b_blk = cand
    b_blk = max(8, _round_up(b_blk, 8))
    B_pad = _round_up(B, b_blk)

    # x: (B, T, IN) -> time-major, zero-padded (T, B_pad, IN_pad), MXU dtype.
    xt = jnp.transpose(jnp.asarray(x, jnp.float32), (1, 0, 2))
    xt = jnp.pad(xt, ((0, 0), (0, B_pad - B), (0, IN_pad - IN))).astype(mxu_dtype)

    inputs = [xt]
    in_specs = [pl.BlockSpec((T, b_blk, IN_pad), lambda b: (0, b, 0))]

    for li, (w_ih, w_hh, b_ih, b_hh) in enumerate(layer_params):
        in_dim_pad = IN_pad if li == 0 else H_pad
        w_ih = jnp.asarray(w_ih, jnp.float32)
        w_hh = jnp.asarray(w_hh, jnp.float32)
        w_ih_t = jnp.zeros((in_dim_pad, H_pad), jnp.float32)
        w_ih_t = w_ih_t.at[:w_ih.shape[1], :H].set(w_ih.T).astype(mxu_dtype)
        w_hh_t = jnp.zeros((H_pad, H_pad), jnp.float32).at[:H, :H].set(
            w_hh.T).astype(mxu_dtype)
        bias = jnp.zeros((1, H_pad), jnp.float32).at[0, :H].set(
            jnp.asarray(b_ih, jnp.float32) + jnp.asarray(b_hh, jnp.float32))
        inputs += [w_ih_t, w_hh_t, bias]
        in_specs += [
            pl.BlockSpec((in_dim_pad, H_pad), lambda b: (0, 0)),
            pl.BlockSpec((H_pad, H_pad), lambda b: (0, 0)),
            pl.BlockSpec((1, H_pad), lambda b: (0, 0)),
        ]

    fc_w_t = jnp.zeros((H_pad, C_pad), jnp.float32).at[:H, :C].set(
        jnp.asarray(fc_w, jnp.float32).T).astype(mxu_dtype)
    fc_b_p = jnp.zeros((1, C_pad), jnp.float32).at[0, :C].set(
        jnp.asarray(fc_b, jnp.float32))
    inputs += [fc_w_t, fc_b_p]
    in_specs += [
        pl.BlockSpec((H_pad, C_pad), lambda b: (0, 0)),
        pl.BlockSpec((1, C_pad), lambda b: (0, 0)),
    ]

    # Loop policy: hoist W_hh / full unroll only while the weight tile fits the
    # vreg file comfortably; otherwise read per step and unroll by 4.
    hoist_whh = H_pad <= (256 if mxu_bytes == 2 else 128)
    unroll = True if (T <= 32 and hoist_whh) else min(4, T)

    kernel = make_rnn_kernel(num_layers=len(layer_params), seq_len=T,
                             hoist_whh=hoist_whh, unroll=unroll)
    out_padded = pl.pallas_call(
        kernel,
        out_shape=jax.ShapeDtypeStruct((B_pad, C_pad), jnp.float32),
        grid=(B_pad // b_blk,),
        in_specs=in_specs,
        out_specs=pl.BlockSpec((b_blk, C_pad), lambda b: (b, 0)),
        scratch_shapes=[
            pltpu.VMEM((T, b_blk, H_pad), mxu_dtype),  # gates / inter-layer seq (in place)
        ],
        compiler_params=pltpu.CompilerParams(
            dimension_semantics=("parallel",),   # batch shards across TCs (v7x)
            vmem_limit_bytes=vmem_budget,        # ~102 MiB v5e/v6e, ~51 MiB v7x
        ),
    )(*inputs)

    return out_padded[:B, :C]


def rnn_model_ref(x, layer_params, fc_w, fc_b):
    """Pure-JAX reference mirroring torch semantics (unpadded, f32)."""
    h_seq = x
    for (w_ih, w_hh, b_ih, b_hh) in layer_params:
        B, T, _ = h_seq.shape
        h = jnp.zeros((B, w_hh.shape[0]), jnp.float32)
        outs = []
        for t in range(T):
            h = jnp.tanh(h_seq[:, t, :] @ w_ih.T + b_ih + h @ w_hh.T + b_hh)
            outs.append(h)
        h_seq = jnp.stack(outs, axis=1)
    return h_seq[:, -1, :] @ fc_w.T + fc_b


def _make_params(key, input_size, hidden_size, num_layers, num_classes):
    bound = 1.0 / jnp.sqrt(jnp.float32(hidden_size))
    layer_params = []
    for layer in range(num_layers):
        in_dim = input_size if layer == 0 else hidden_size
        keys = jax.random.split(key, 5)
        key = keys[0]
        w_ih = jax.random.uniform(keys[1], (hidden_size, in_dim), jnp.float32, -bound, bound)
        w_hh = jax.random.uniform(keys[2], (hidden_size, hidden_size), jnp.float32, -bound, bound)
        b_ih = jax.random.uniform(keys[3], (hidden_size,), jnp.float32, -bound, bound)
        b_hh = jax.random.uniform(keys[4], (hidden_size,), jnp.float32, -bound, bound)
        layer_params.append((w_ih, w_hh, b_ih, b_hh))
    keys = jax.random.split(key, 3)
    fc_w = jax.random.uniform(keys[1], (num_classes, hidden_size), jnp.float32, -bound, bound)
    fc_b = jax.random.uniform(keys[2], (num_classes,), jnp.float32, -bound, bound)
    return layer_params, fc_w, fc_b


if __name__ == "__main__":
    # Small shapes consistent with the module's forward.
    batch, seq_len = 2, 8
    input_size, hidden_size, num_layers, num_classes = 16, 32, 2, 3

    key = jax.random.PRNGKey(0)
    k_x, k_p, k_x2 = jax.random.split(key, 3)
    x = jax.random.normal(k_x, (batch, seq_len, input_size), dtype=jnp.float32)
    layer_params, fc_w, fc_b = _make_params(k_p, input_size, hidden_size,
                                            num_layers, num_classes)

    ref = rnn_model_ref(x, layer_params, fc_w, fc_b)

    # Exact-f32 path (mxu_dtype=f32): tight tolerance vs. the torch-style reference.
    out_f32 = jax.block_until_ready(
        rnn_model_forward(x, layer_params, fc_w, fc_b, mxu_dtype=jnp.float32))
    assert out_f32.shape == (batch, num_classes)
    assert jnp.allclose(out_f32, ref, rtol=1e-4, atol=1e-4), (out_f32, ref)

    # Default bf16-MXU path (f32 accumulation / f32 carried h): looser tolerance.
    out_bf16 = jax.block_until_ready(
        rnn_model_forward(x, layer_params, fc_w, fc_b))
    assert out_bf16.shape == (batch, num_classes)
    assert jnp.allclose(out_bf16, ref, rtol=5e-2, atol=5e-2), (out_bf16, ref)

    # Larger batch exercises the auto batch-block selection and a >1 grid
    # ("parallel" axis -> both TensorCores on v7x).
    batch_big = 64
    x_big = jax.random.normal(k_x2, (batch_big, seq_len, input_size), dtype=jnp.float32)
    ref_big = rnn_model_ref(x_big, layer_params, fc_w, fc_b)
    out_big = jax.block_until_ready(
        rnn_model_forward(x_big, layer_params, fc_w, fc_b))
    assert out_big.shape == (batch_big, num_classes)
    assert jnp.allclose(out_big, ref_big, rtol=5e-2, atol=5e-2), (out_big, ref_big)

    print("KERNEL_OK")
</pallas_src>

<mosaic_0001>
module attributes {stable_mosaic.version = 11 : i64} {
  func.func @kernel(%arg0: i32, %arg1: memref<8x8x128xf32, #tpu.memory_space<vmem>>, %arg2: memref<128x128xf32, #tpu.memory_space<vmem>>, %arg3: memref<128x128xf32, #tpu.memory_space<vmem>>, %arg4: memref<1x128xf32, #tpu.memory_space<vmem>>, %arg5: memref<128x128xf32, #tpu.memory_space<vmem>>, %arg6: memref<128x128xf32, #tpu.memory_space<vmem>>, %arg7: memref<1x128xf32, #tpu.memory_space<vmem>>, %arg8: memref<128x128xf32, #tpu.memory_space<vmem>>, %arg9: memref<1x128xf32, #tpu.memory_space<vmem>>, %arg10: memref<8x128xf32, #tpu.memory_space<vmem>>, %arg11: memref<8x8x128xf32, #tpu.memory_space<vmem>>) attributes {dimension_semantics = [#tpu.dimension_semantics<parallel>], iteration_bounds = array<i64: 1>, scalar_prefetch = 0 : i64, scratch_operands = 1 : i64, tpu.core_type = #tpu.core_type<tc>, window_params = [{transform_indices = @transform_0, window_bounds = array<i64: 8, 8, 128>}, {pipeline_mode = #tpu.pipeline_mode<synchronous>, transform_indices = @transform_1, window_bounds = array<i64: 128, 128>}, {pipeline_mode = #tpu.pipeline_mode<synchronous>, transform_indices = @transform_2, window_bounds = array<i64: 128, 128>}, {pipeline_mode = #tpu.pipeline_mode<synchronous>, transform_indices = @transform_3, window_bounds = array<i64: 1, 128>}, {pipeline_mode = #tpu.pipeline_mode<synchronous>, transform_indices = @transform_4, window_bounds = array<i64: 128, 128>}, {pipeline_mode = #tpu.pipeline_mode<synchronous>, transform_indices = @transform_5, window_bounds = array<i64: 128, 128>}, {pipeline_mode = #tpu.pipeline_mode<synchronous>, transform_indices = @transform_6, window_bounds = array<i64: 1, 128>}, {pipeline_mode = #tpu.pipeline_mode<synchronous>, transform_indices = @transform_7, window_bounds = array<i64: 128, 128>}, {pipeline_mode = #tpu.pipeline_mode<synchronous>, transform_indices = @transform_8, window_bounds = array<i64: 1, 128>}, {transform_indices = @transform_9, window_bounds = array<i64: 8, 128>}]} {
    %c0 = arith.constant 0 : index
    %c0_0 = arith.constant 0 : index
    %c0_1 = arith.constant 0 : index
    %0 = vector.load %arg1[%c0, %c0_0, %c0_1] : memref<8x8x128xf32, #tpu.memory_space<vmem>>, vector<8x8x128xf32>
    %1 = vector.shape_cast %0 : vector<8x8x128xf32> to vector<64x128xf32>
    %c0_2 = arith.constant 0 : index
    %c0_3 = arith.constant 0 : index
    %2 = vector.load %arg2[%c0_2, %c0_3] : memref<128x128xf32, #tpu.memory_space<vmem>>, vector<128x128xf32>
    %cst = arith.constant dense<0.000000e+00> : vector<64x128xf32>
    %3 = tpu.matmul %1, %2, %cst {dimension_numbers = #tpu.dot_dimension_numbers<[1], [0], [0], [1], [0, 0, 1, 1], [], []>} : vector<64x128xf32>, vector<128x128xf32>, vector<64x128xf32> -> vector<64x128xf32>
    %c0_4 = arith.constant 0 : index
    %c0_5 = arith.constant 0 : index
    %4 = vector.load %arg4[%c0_4, %c0_5] : memref<1x128xf32, #tpu.memory_space<vmem>>, vector<1x128xf32>
    %5 = vector.broadcast %4 : vector<1x128xf32> to vector<64x128xf32>
    %6 = arith.addf %3, %5 : vector<64x128xf32>
    %7 = vector.shape_cast %6 : vector<64x128xf32> to vector<8x8x128xf32>
    %c0_6 = arith.constant 0 : index
    %c0_7 = arith.constant 0 : index
    %c0_8 = arith.constant 0 : index
    %8 = vector.load %arg11[%c0_6, %c0_7, %c0_8] : memref<8x8x128xf32, #tpu.memory_space<vmem>>, vector<8x8x128xf32>
    tpu.vector_store %arg11[%c0_6, %c0_7, %c0_8], %7 {strides = array<i32>} : memref<8x8x128xf32, #tpu.memory_space<vmem>>, vector<8x8x128xf32>,
    %c0_9 = arith.constant 0 : index
    %c0_10 = arith.constant 0 : index
    %9 = vector.load %arg3[%c0_9, %c0_10] : memref<128x128xf32, #tpu.memory_space<vmem>>, vector<128x128xf32>
    %cst_11 = arith.constant 0.000000e+00 : f32
    %10 = vector.broadcast %cst_11 : f32 to vector<8x128xf32>
    %c0_i32 = arith.constant 0 : i32
    %11 = arith.index_cast %c0_i32 : i32 to index
    %c0_12 = arith.constant 0 : index
    %c0_13 = arith.constant 0 : index
    %12 = vector.load %arg11[%11, %c0_12, %c0_13] : memref<8x8x128xf32, #tpu.memory_space<vmem>>, vector<1x8x128xf32>
    %13 = vector.shape_cast %12 : vector<1x8x128xf32> to vector<8x128xf32>
    %cst_14 = arith.constant dense<0.000000e+00> : vector<8x128xf32>
    %14 = tpu.matmul %10, %9, %cst_14 {dimension_numbers = #tpu.dot_dimension_numbers<[1], [0], [0], [1], [0, 0, 1, 1], [], []>} : vector<8x128xf32>, vector<128x128xf32>, vector<8x128xf32> -> vector<8x128xf32>
    %15 = arith.addf %13, %14 : vector<8x128xf32>
    %16 = math.tanh %15 : vector<8x128xf32>
    %17 = arith.index_cast %c0_i32 : i32 to index
    %c0_15 = arith.constant 0 : index
    %c0_16 = arith.constant 0 : index
    %18 = vector.load %arg11[%17, %c0_15, %c0_16] : memref<8x8x128xf32, #tpu.memory_space<vmem>>, vector<1x8x128xf32>
    %19 = vector.shape_cast %18 : vector<1x8x128xf32> to vector<8x128xf32>
    %20 = vector.shape_cast %16 : vector<8x128xf32> to vector<1x8x128xf32>
    tpu.vector_store %arg11[%17, %c0_15, %c0_16], %20 {strides = array<i32>} : memref<8x8x128xf32, #tpu.memory_space<vmem>>, vector<1x8x128xf32>,
    %c1_i32 = arith.constant 1 : i32
    %21 = arith.index_cast %c1_i32 : i32 to index
    %c0_17 = arith.constant 0 : index
    %c0_18 = arith.constant 0 : index
    %22 = vector.load %arg11[%21, %c0_17, %c0_18] : memref<8x8x128xf32, #tpu.memory_space<vmem>>, vector<1x8x128xf32>
    %23 = vector.shape_cast %22 : vector<1x8x128xf32> to vector<8x128xf32>
    %cst_19 = arith.constant dense<0.000000e+00> : vector<8x128xf32>
    %24 = tpu.matmul %16, %9, %cst_19 {dimension_numbers = #tpu.dot_dimension_numbers<[1], [0], [0], [1], [0, 0, 1, 1], [], []>} : vector<8x128xf32>, vector<128x128xf32>, vector<8x128xf32> -> vector<8x128xf32>
    %25 = arith.addf %23, %24 : vector<8x128xf32>
    %26 = math.tanh %25 : vector<8x128xf32>
    %27 = arith.index_cast %c1_i32 : i32 to index
    %c0_20 = arith.constant 0 : index
    %c0_21 = arith.constant 0 : index
    %28 = vector.load %arg11[%27, %c0_20, %c0_21] : memref<8x8x128xf32, #tpu.memory_space<vmem>>, vector<1x8x128xf32>
    %29 = vector.shape_cast %28 : vector<1x8x128xf32> to vector<8x128xf32>
    %30 = vector.shape_cast %26 : vector<8x128xf32> to vector<1x8x128xf32>
    tpu.vector_store %arg11[%27, %c0_20, %c0_21], %30 {strides = array<i32>} : memref<8x8x128xf32, #tpu.memory_space<vmem>>, vector<1x8x128xf32>,
    %c2_i32 = arith.constant 2 : i32
    %31 = arith.index_cast %c2_i32 : i32 to index
    %c0_22 = arith.constant 0 : index
    %c0_23 = arith.constant 0 : index
    %32 = vector.load %arg11[%31, %c0_22, %c0_23] : memref<8x8x128xf32, #tpu.memory_space<vmem>>, vector<1x8x128xf32>
    %33 = vector.shape_cast %32 : vector<1x8x128xf32> to vector<8x128xf32>
    %cst_24 = arith.constant dense<0.000000e+00> : vector<8x128xf32>
    %34 = tpu.matmul %26, %9, %cst_24 {dimension_numbers = #tpu.dot_dimension_numbers<[1], [0], [0], [1], [0, 0, 1, 1], [], []>} : vector<8x128xf32>, vector<128x128xf32>, vector<8x128xf32> -> vector<8x128xf32>
    %35 = arith.addf %33, %34 : vector<8x128xf32>
    %36 = math.tanh %35 : vector<8x128xf32>
    %37 = arith.index_cast %c2_i32 : i32 to index
    %c0_25 = arith.constant 0 : index
    %c0_26 = arith.constant 0 : index
    %38 = vector.load %arg11[%37, %c0_25, %c0_26] : memref<8x8x128xf32, #tpu.memory_space<vmem>>, vector<1x8x128xf32>
    %39 = vector.shape_cast %38 : vector<1x8x128xf32> to vector<8x128xf32>
    %40 = vector.shape_cast %36 : vector<8x128xf32> to vector<1x8x128xf32>
    tpu.vector_store %arg11[%37, %c0_25, %c0_26], %40 {strides = array<i32>} : memref<8x8x128xf32, #tpu.memory_space<vmem>>, vector<1x8x128xf32>,
    %c3_i32 = arith.constant 3 : i32
    %41 = arith.index_cast %c3_i32 : i32 to index
    %c0_27 = arith.constant 0 : index
    %c0_28 = arith.constant 0 : index
    %42 = vector.load %arg11[%41, %c0_27, %c0_28] : memref<8x8x128xf32, #tpu.memory_space<vmem>>, vector<1x8x128xf32>
    %43 = vector.shape_cast %42 : vector<1x8x128xf32> to vector<8x128xf32>
    %cst_29 = arith.constant dense<0.000000e+00> : vector<8x128xf32>
    %44 = tpu.matmul %36, %9, %cst_29 {dimension_numbers = #tpu.dot_dimension_numbers<[1], [0], [0], [1], [0, 0, 1, 1], [], []>} : vector<8x128xf32>, vector<128x128xf32>, vector<8x128xf32> -> vector<8x128xf32>
    %45 = arith.addf %43, %44 : vector<8x128xf32>
    %46 = math.tanh %45 : vector<8x128xf32>
    %47 = arith.index_cast %c3_i32 : i32 to index
    %c0_30 = arith.constant 0 : index
    %c0_31 = arith.constant 0 : index
    %48 = vector.load %arg11[%47, %c0_30, %c0_31] : memref<8x8x128xf32, #tpu.memory_space<vmem>>, vector<1x8x128xf32>
    %49 = vector.shape_cast %48 : vector<1x8x128xf32> to vector<8x128xf32>
    %50 = vector.shape_cast %46 : vector<8x128xf32> to vector<1x8x128xf32>
    tpu.vector_store %arg11[%47, %c0_30, %c0_31], %50 {strides = array<i32>} : memref<8x8x128xf32, #tpu.memory_space<vmem>>, vector<1x8x128xf32>,
    %c4_i32 = arith.constant 4 : i32
    %51 = arith.index_cast %c4_i32 : i32 to index
    %c0_32 = arith.constant 0 : index
    %c0_33 = arith.constant 0 : index
    %52 = vector.load %arg11[%51, %c0_32, %c0_33] : memref<8x8x128xf32, #tpu.memory_space<vmem>>, vector<1x8x128xf32>
    %53 = vector.shape_cast %52 : vector<1x8x128xf32> to vector<8x128xf32>
    %cst_34 = arith.constant dense<0.000000e+00> : vector<8x128xf32>
    %54 = tpu.matmul %46, %9, %cst_34 {dimension_numbers = #tpu.dot_dimension_numbers<[1], [0], [0], [1], [0, 0, 1, 1], [], []>} : vector<8x128xf32>, vector<128x128xf32>, vector<8x128xf32> -> vector<8x128xf32>
    %55 = arith.addf %53, %54 : vector<8x128xf32>
    %56 = math.tanh %55 : vector<8x128xf32>
    %57 = arith.index_cast %c4_i32 : i32 to index
    %c0_35 = arith.constant 0 : index
    %c0_36 = arith.constant 0 : index
    %58 = vector.load %arg11[%57, %c0_35, %c0_36] : memref<8x8x128xf32, #tpu.memory_space<vmem>>, vector<1x8x128xf32>
    %59 = vector.shape_cast %58 : vector<1x8x128xf32> to vector<8x128xf32>
    %60 = vector.shape_cast %56 : vector<8x128xf32> to vector<1x8x128xf32>
    tpu.vector_store %arg11[%57, %c0_35, %c0_36], %60 {strides = array<i32>} : memref<8x8x128xf32, #tpu.memory_space<vmem>>, vector<1x8x128xf32>,
    %c5_i32 = arith.constant 5 : i32
    %61 = arith.index_cast %c5_i32 : i32 to index
    %c0_37 = arith.constant 0 : index
    %c0_38 = arith.constant 0 : index
    %62 = vector.load %arg11[%61, %c0_37, %c0_38] : memref<8x8x128xf32, #tpu.memory_space<vmem>>, vector<1x8x128xf32>
    %63 = vector.shape_cast %62 : vector<1x8x128xf32> to vector<8x128xf32>
    %cst_39 = arith.constant dense<0.000000e+00> : vector<8x128xf32>
    %64 = tpu.matmul %56, %9, %cst_39 {dimension_numbers = #tpu.dot_dimension_numbers<[1], [0], [0], [1], [0, 0, 1, 1], [], []>} : vector<8x128xf32>, vector<128x128xf32>, vector<8x128xf32> -> vector<8x128xf32>
    %65 = arith.addf %63, %64 : vector<8x128xf32>
    %66 = math.tanh %65 : vector<8x128xf32>
    %67 = arith.index_cast %c5_i32 : i32 to index
    %c0_40 = arith.constant 0 : index
    %c0_41 = arith.constant 0 : index
    %68 = vector.load %arg11[%67, %c0_40, %c0_41] : memref<8x8x128xf32, #tpu.memory_space<vmem>>, vector<1x8x128xf32>
    %69 = vector.shape_cast %68 : vector<1x8x128xf32> to vector<8x128xf32>
    %70 = vector.shape_cast %66 : vector<8x128xf32> to vector<1x8x128xf32>
    tpu.vector_store %arg11[%67, %c0_40, %c0_41], %70 {strides = array<i32>} : memref<8x8x128xf32, #tpu.memory_space<vmem>>, vector<1x8x128xf32>,
    %c6_i32 = arith.constant 6 : i32
    %71 = arith.index_cast %c6_i32 : i32 to index
    %c0_42 = arith.constant 0 : index
    %c0_43 = arith.constant 0 : index
    %72 = vector.load %arg11[%71, %c0_42, %c0_43] : memref<8x8x128xf32, #tpu.memory_space<vmem>>, vector<1x8x128xf32>
    %73 = vector.shape_cast %72 : vector<1x8x128xf32> to vector<8x128xf32>
    %cst_44 = arith.constant dense<0.000000e+00> : vector<8x128xf32>
    %74 = tpu.matmul %66, %9, %cst_44 {dimension_numbers = #tpu.dot_dimension_numbers<[1], [0], [0], [1], [0, 0, 1, 1], [], []>} : vector<8x128xf32>, vector<128x128xf32>, vector<8x128xf32> -> vector<8x128xf32>
    %75 = arith.addf %73, %74 : vector<8x128xf32>
    %76 = math.tanh %75 : vector<8x128xf32>
    %77 = arith.index_cast %c6_i32 : i32 to index
    %c0_45 = arith.constant 0 : index
    %c0_46 = arith.constant 0 : index
    %78 = vector.load %arg11[%77, %c0_45, %c0_46] : memref<8x8x128xf32, #tpu.memory_space<vmem>>, vector<1x8x128xf32>
    %79 = vector.shape_cast %78 : vector<1x8x128xf32> to vector<8x128xf32>
    %80 = vector.shape_cast %76 : vector<8x128xf32> to vector<1x8x128xf32>
    tpu.vector_store %arg11[%77, %c0_45, %c0_46], %80 {strides = array<i32>} : memref<8x8x128xf32, #tpu.memory_space<vmem>>, vector<1x8x128xf32>,
    %c7_i32 = arith.constant 7 : i32
    %81 = arith.index_cast %c7_i32 : i32 to index
    %c0_47 = arith.constant 0 : index
    %c0_48 = arith.constant 0 : index
    %82 = vector.load %arg11[%81, %c0_47, %c0_48] : memref<8x8x128xf32, #tpu.memory_space<vmem>>, vector<1x8x128xf32>
    %83 = vector.shape_cast %82 : vector<1x8x128xf32> to vector<8x128xf32>
    %cst_49 = arith.constant dense<0.000000e+00> : vector<8x128xf32>
    %84 = tpu.matmul %76, %9, %cst_49 {dimension_numbers = #tpu.dot_dimension_numbers<[1], [0], [0], [1], [0, 0, 1, 1], [], []>} : vector<8x128xf32>, vector<128x128xf32>, vector<8x128xf32> -> vector<8x128xf32>
    %85 = arith.addf %83, %84 : vector<8x128xf32>
    %86 = math.tanh %85 : vector<8x128xf32>
    %87 = arith.index_cast %c7_i32 : i32 to index
    %c0_50 = arith.constant 0 : index
    %c0_51 = arith.constant 0 : index
    %88 = vector.load %arg11[%87, %c0_50, %c0_51] : memref<8x8x128xf32, #tpu.memory_space<vmem>>, vector<1x8x128xf32>
    %89 = vector.shape_cast %88 : vector<1x8x128xf32> to vector<8x128xf32>
    %90 = vector.shape_cast %86 : vector<8x128xf32> to vector<1x8x128xf32>
    tpu.vector_store %arg11[%87, %c0_50, %c0_51], %90 {strides = array<i32>} : memref<8x8x128xf32, #tpu.memory_space<vmem>>, vector<1x8x128xf32>,
    %c8_i32 = arith.constant 8 : i32
    %c0_52 = arith.constant 0 : index
    %c0_53 = arith.constant 0 : index
    %c0_54 = arith.constant 0 : index
    %91 = vector.load %arg11[%c0_52, %c0_53, %c0_54] : memref<8x8x128xf32, #tpu.memory_space<vmem>>, vector<8x8x128xf32>
    %92 = vector.shape_cast %91 : vector<8x8x128xf32> to vector<64x128xf32>
    %c0_55 = arith.constant 0 : index
    %c0_56 = arith.constant 0 : index
    %93 = vector.load %arg5[%c0_55, %c0_56] : memref<128x128xf32, #tpu.memory_space<vmem>>, vector<128x128xf32>
    %cst_57 = arith.constant dense<0.000000e+00> : vector<64x128xf32>
    %94 = tpu.matmul %92, %93, %cst_57 {dimension_numbers = #tpu.dot_dimension_numbers<[1], [0], [0], [1], [0, 0, 1, 1], [], []>} : vector<64x128xf32>, vector<128x128xf32>, vector<64x128xf32> -> vector<64x128xf32>
    %c0_58 = arith.constant 0 : index
    %c0_59 = arith.constant 0 : index
    %95 = vector.load %arg7[%c0_58, %c0_59] : memref<1x128xf32, #tpu.memory_space<vmem>>, vector<1x128xf32>
    %96 = vector.broadcast %95 : vector<1x128xf32> to vector<64x128xf32>
    %97 = arith.addf %94, %96 : vector<64x128xf32>
    %98 = vector.shape_cast %97 : vector<64x128xf32> to vector<8x8x128xf32>
    %c0_60 = arith.constant 0 : index
    %c0_61 = arith.constant 0 : index
    %c0_62 = arith.constant 0 : index
    %99 = vector.load %arg11[%c0_60, %c0_61, %c0_62] : memref<8x8x128xf32, #tpu.memory_space<vmem>>, vector<8x8x128xf32>
    tpu.vector_store %arg11[%c0_60, %c0_61, %c0_62], %98 {strides = array<i32>} : memref<8x8x128xf32, #tpu.memory_space<vmem>>, vector<8x8x128xf32>,
    %c0_63 = arith.constant 0 : index
    %c0_64 = arith.constant 0 : index
    %100 = vector.load %arg6[%c0_63, %c0_64] : memref<128x128xf32, #tpu.memory_space<vmem>>, vector<128x128xf32>
    %cst_65 = arith.constant 0.000000e+00 : f32
    %101 = vector.broadcast %cst_65 : f32 to vector<8x128xf32>
    %c0_i32_66 = arith.constant 0 : i32
    %102 = arith.index_cast %c0_i32_66 : i32 to index
    %c0_67 = arith.constant 0 : index
    %c0_68 = arith.constant 0 : index
    %103 = vector.load %arg11[%102, %c0_67, %c0_68] : memref<8x8x128xf32, #tpu.memory_space<vmem>>, vector<1x8x128xf32>
    %104 = vector.shape_cast %103 : vector<1x8x128xf32> to vector<8x128xf32>
    %cst_69 = arith.constant dense<0.000000e+00> : vector<8x128xf32>
    %105 = tpu.matmul %101, %100, %cst_69 {dimension_numbers = #tpu.dot_dimension_numbers<[1], [0], [0], [1], [0, 0, 1, 1], [], []>} : vector<8x128xf32>, vector<128x128xf32>, vector<8x128xf32> -> vector<8x128xf32>
    %106 = arith.addf %104, %105 : vector<8x128xf32>
    %107 = math.tanh %106 : vector<8x128xf32>
    %c1_i32_70 = arith.constant 1 : i32
    %108 = arith.index_cast %c1_i32_70 : i32 to index
    %c0_71 = arith.constant 0 : index
    %c0_72 = arith.constant 0 : index
    %109 = vector.load %arg11[%108, %c0_71, %c0_72] : memref<8x8x128xf32, #tpu.memory_space<vmem>>, vector<1x8x128xf32>
    %110 = vector.shape_cast %109 : vector<1x8x128xf32> to vector<8x128xf32>
    %cst_73 = arith.constant dense<0.000000e+00> : vector<8x128xf32>
    %111 = tpu.matmul %107, %100, %cst_73 {dimension_numbers = #tpu.dot_dimension_numbers<[1], [0], [0], [1], [0, 0, 1, 1], [], []>} : vector<8x128xf32>, vector<128x128xf32>, vector<8x128xf32> -> vector<8x128xf32>
    %112 = arith.addf %110, %111 : vector<8x128xf32>
    %113 = math.tanh %112 : vector<8x128xf32>
    %c2_i32_74 = arith.constant 2 : i32
    %114 = arith.index_cast %c2_i32_74 : i32 to index
    %c0_75 = arith.constant 0 : index
    %c0_76 = arith.constant 0 : index
    %115 = vector.load %arg11[%114, %c0_75, %c0_76] : memref<8x8x128xf32, #tpu.memory_space<vmem>>, vector<1x8x128xf32>
    %116 = vector.shape_cast %115 : vector<1x8x128xf32> to vector<8x128xf32>
    %cst_77 = arith.constant dense<0.000000e+00> : vector<8x128xf32>
    %117 = tpu.matmul %113, %100, %cst_77 {dimension_numbers = #tpu.dot_dimension_numbers<[1], [0], [0], [1], [0, 0, 1, 1], [], []>} : vector<8x128xf32>, vector<128x128xf32>, vector<8x128xf32> -> vector<8x128xf32>
    %118 = arith.addf %116, %117 : vector<8x128xf32>
    %119 = math.tanh %118 : vector<8x128xf32>
    %c3_i32_78 = arith.constant 3 : i32
    %120 = arith.index_cast %c3_i32_78 : i32 to index
    %c0_79 = arith.constant 0 : index
    %c0_80 = arith.constant 0 : index
    %121 = vector.load %arg11[%120, %c0_79, %c0_80] : memref<8x8x128xf32, #tpu.memory_space<vmem>>, vector<1x8x128xf32>
    %122 = vector.shape_cast %121 : vector<1x8x128xf32> to vector<8x128xf32>
    %cst_81 = arith.constant dense<0.000000e+00> : vector<8x128xf32>
    %123 = tpu.matmul %119, %100, %cst_81 {dimension_numbers = #tpu.dot_dimension_numbers<[1], [0], [0], [1], [0, 0, 1, 1], [], []>} : vector<8x128xf32>, vector<128x128xf32>, vector<8x128xf32> -> vector<8x128xf32>
    %124 = arith.addf %122, %123 : vector<8x128xf32>
    %125 = math.tanh %124 : vector<8x128xf32>
    %c4_i32_82 = arith.constant 4 : i32
    %126 = arith.index_cast %c4_i32_82 : i32 to index
    %c0_83 = arith.constant 0 : index
    %c0_84 = arith.constant 0 : index
    %127 = vector.load %arg11[%126, %c0_83, %c0_84] : memref<8x8x128xf32, #tpu.memory_space<vmem>>, vector<1x8x128xf32>
    %128 = vector.shape_cast %127 : vector<1x8x128xf32> to vector<8x128xf32>
    %cst_85 = arith.constant dense<0.000000e+00> : vector<8x128xf32>
    %129 = tpu.matmul %125, %100, %cst_85 {dimension_numbers = #tpu.dot_dimension_numbers<[1], [0], [0], [1], [0, 0, 1, 1], [], []>} : vector<8x128xf32>, vector<128x128xf32>, vector<8x128xf32> -> vector<8x128xf32>
    %130 = arith.addf %128, %129 : vector<8x128xf32>
    %131 = math.tanh %130 : vector<8x128xf32>
    %c5_i32_86 = arith.constant 5 : i32
    %132 = arith.index_cast %c5_i32_86 : i32 to index
    %c0_87 = arith.constant 0 : index
    %c0_88 = arith.constant 0 : index
    %133 = vector.load %arg11[%132, %c0_87, %c0_88] : memref<8x8x128xf32, #tpu.memory_space<vmem>>, vector<1x8x128xf32>
    %134 = vector.shape_cast %133 : vector<1x8x128xf32> to vector<8x128xf32>
    %cst_89 = arith.constant dense<0.000000e+00> : vector<8x128xf32>
    %135 = tpu.matmul %131, %100, %cst_89 {dimension_numbers = #tpu.dot_dimension_numbers<[1], [0], [0], [1], [0, 0, 1, 1], [], []>} : vector<8x128xf32>, vector<128x128xf32>, vector<8x128xf32> -> vector<8x128xf32>
    %136 = arith.addf %134, %135 : vector<8x128xf32>
    %137 = math.tanh %136 : vector<8x128xf32>
    %c6_i32_90 = arith.constant 6 : i32
    %138 = arith.index_cast %c6_i32_90 : i32 to index
    %c0_91 = arith.constant 0 : index
    %c0_92 = arith.constant 0 : index
    %139 = vector.load %arg11[%138, %c0_91, %c0_92] : memref<8x8x128xf32, #tpu.memory_space<vmem>>, vector<1x8x128xf32>
    %140 = vector.shape_cast %139 : vector<1x8x128xf32> to vector<8x128xf32>
    %cst_93 = arith.constant dense<0.000000e+00> : vector<8x128xf32>
    %141 = tpu.matmul %137, %100, %cst_93 {dimension_numbers = #tpu.dot_dimension_numbers<[1], [0], [0], [1], [0, 0, 1, 1], [], []>} : vector<8x128xf32>, vector<128x128xf32>, vector<8x128xf32> -> vector<8x128xf32>
    %142 = arith.addf %140, %141 : vector<8x128xf32>
    %143 = math.tanh %142 : vector<8x128xf32>
    %c7_i32_94 = arith.constant 7 : i32
    %144 = arith.index_cast %c7_i32_94 : i32 to index
    %c0_95 = arith.constant 0 : index
    %c0_96 = arith.constant 0 : index
    %145 = vector.load %arg11[%144, %c0_95, %c0_96] : memref<8x8x128xf32, #tpu.memory_space<vmem>>, vector<1x8x128xf32>
    %146 = vector.shape_cast %145 : vector<1x8x128xf32> to vector<8x128xf32>
    %cst_97 = arith.constant dense<0.000000e+00> : vector<8x128xf32>
    %147 = tpu.matmul %143, %100, %cst_97 {dimension_numbers = #tpu.dot_dimension_numbers<[1], [0], [0], [1], [0, 0, 1, 1], [], []>} : vector<8x128xf32>, vector<128x128xf32>, vector<8x128xf32> -> vector<8x128xf32>
    %148 = arith.addf %146, %147 : vector<8x128xf32>
    %149 = math.tanh %148 : vector<8x128xf32>
    %c8_i32_98 = arith.constant 8 : i32
    %c0_99 = arith.constant 0 : index
    %c0_100 = arith.constant 0 : index
    %150 = vector.load %arg8[%c0_99, %c0_100] : memref<128x128xf32, #tpu.memory_space<vmem>>, vector<128x128xf32>
    %cst_101 = arith.constant dense<0.000000e+00> : vector<8x128xf32>
    %151 = tpu.matmul %149, %150, %cst_101 {dimension_numbers = #tpu.dot_dimension_numbers<[1], [0], [0], [1], [0, 0, 1, 1], [], []>} : vector<8x128xf32>, vector<128x128xf32>, vector<8x128xf32> -> vector<8x128xf32>
    %c0_102 = arith.constant 0 : index
    %c0_103 = arith.constant 0 : index
    %152 = vector.load %arg9[%c0_102, %c0_103] : memref<1x128xf32, #tpu.memory_space<vmem>>, vector<1x128xf32>
    %153 = vector.broadcast %152 : vector<1x128xf32> to vector<8x128xf32>
    %154 = arith.addf %151, %153 : vector<8x128xf32>
    %c0_104 = arith.constant 0 : index
    %c0_105 = arith.constant 0 : index
    %155 = vector.load %arg10[%c0_104, %c0_105] : memref<8x128xf32, #tpu.memory_space<vmem>>, vector<8x128xf32>
    tpu.vector_store %arg10[%c0_104, %c0_105], %154 {strides = array<i32>} : memref<8x128xf32, #tpu.memory_space<vmem>>, vector<8x128xf32>,
    return
  }
  func.func @transform_0(%arg0: i32) -> (i32, i32, i32) {
    %c0_i32 = arith.constant 0 : i32
    %c0_i32_0 = arith.constant 0 : i32
    %c0_i32_1 = arith.constant 0 : i32
    return %c0_i32, %arg0, %c0_i32_0 : i32, i32, i32
  }
  func.func @transform_1(%arg0: i32) -> (i32, i32) {
    %c0_i32 = arith.constant 0 : i32
    %c0_i32_0 = arith.constant 0 : i32
    %c0_i32_1 = arith.constant 0 : i32
    return %c0_i32, %c0_i32_0 : i32, i32
  }
  func.func @transform_2(%arg0: i32) -> (i32, i32) {
    %c0_i32 = arith.constant 0 : i32
    %c0_i32_0 = arith.constant 0 : i32
    %c0_i32_1 = arith.constant 0 : i32
    return %c0_i32, %c0_i32_0 : i32, i32
  }
  func.func @transform_3(%arg0: i32) -> (i32, i32) {
    %c0_i32 = arith.constant 0 : i32
    %c0_i32_0 = arith.constant 0 : i32
    %c0_i32_1 = arith.constant 0 : i32
    return %c0_i32, %c0_i32_0 : i32, i32
  }
  func.func @transform_4(%arg0: i32) -> (i32, i32) {
    %c0_i32 = arith.constant 0 : i32
    %c0_i32_0 = arith.constant 0 : i32
    %c0_i32_1 = arith.constant 0 : i32
    return %c0_i32, %c0_i32_0 : i32, i32
  }
  func.func @transform_5(%arg0: i32) -> (i32, i32) {
    %c0_i32 = arith.constant 0 : i32
    %c0_i32_0 = arith.constant 0 : i32
    %c0_i32_1 = arith.constant 0 : i32
    return %c0_i32, %c0_i32_0 : i32, i32
  }
  func.func @transform_6(%arg0: i32) -> (i32, i32) {
    %c0_i32 = arith.constant 0 : i32
    %c0_i32_0 = arith.constant 0 : i32
    %c0_i32_1 = arith.constant 0 : i32
    return %c0_i32, %c0_i32_0 : i32, i32
  }
  func.func @transform_7(%arg0: i32) -> (i32, i32) {
    %c0_i32 = arith.constant 0 : i32
    %c0_i32_0 = arith.constant 0 : i32
    %c0_i32_1 = arith.constant 0 : i32
    return %c0_i32, %c0_i32_0 : i32, i32
  }
  func.func @transform_8(%arg0: i32) -> (i32, i32) {
    %c0_i32 = arith.constant 0 : i32
    %c0_i32_0 = arith.constant 0 : i32
    %c0_i32_1 = arith.constant 0 : i32
    return %c0_i32, %c0_i32_0 : i32, i32
  }
  func.func @transform_9(%arg0: i32) -> (i32, i32) {
    %c0_i32 = arith.constant 0 : i32
    %c0_i32_0 = arith.constant 0 : i32
    return %arg0, %c0_i32 : i32, i32
  }
}

</mosaic_0001>

<bundles_post_ra>
// kernel: tpu_custom_call.1
= control target key start
LH: loop header
LB: loop body
LE: loop exit
PB: predicated region body
PF: predicated region fallthrough
CT: control target
= control target key end

     0   :  { %14 = vsyncpa [#allocation4], 0  ;;  %s1438_s0 = inlined_call_operand.hbm [shape: f32[8,8,128], index: 0, kind: input, shape index: {}]   ;;  %s1439_s1 = inlined_call_operand.hbm [shape: f32[128,128], index: 1, kind: input, shape index: {}]   ;;  %s1440_s2 = inlined_call_operand.hbm [shape: f32[128,128], index: 2, kind: input, shape index: {}]   ;;  %s1441_s3 = inlined_call_operand.vmem [shape: f32[1,128], index: 3, kind: input, shape index: {}]   ;;  %s1442_s4 = inlined_call_operand.hbm [shape: f32[128,128], index: 4, kind: input, shape index: {}]   ;;  %s1443_s5 = inlined_call_operand.hbm [shape: f32[128,128], index: 5, kind: input, shape index: {}]   ;;  %s1444_s6 = inlined_call_operand.vmem [shape: f32[1,128], index: 6, kind: input, shape index: {}]   ;;  %s1445_s7 = inlined_call_operand.hbm [shape: f32[128,128], index: 7, kind: input, shape index: {}]   ;;  %s1446_s8 = inlined_call_operand.vmem [shape: f32[1,128], index: 8, kind: input, shape index: {}]   ;;  %s1447_s9 = inlined_call_operand.hbm [shape: f32[8,128], index: 9, kind: output, shape index: {}]  }
   0x1   :  { %15 = vsyncpa [#allocation7], 0 }
   0x2   :  { %16 = vsyncpa [#allocation10], 0 }
   0x3   :  { %17 = vsyncpa [#allocation13], 0 }
   0x4   :  { %18 = vsyncpa [#allocation5], 0  ;;  %s36_s11 = sshll.u32 %s1439_s1, 4  ;;  %s980_s12 = smov [#allocation6]   ;;  %s37_s11 = int_to_ptr.hbm [resolvable:$true] %s36_s11 }
   0x5   :  { %s38_s13 = sshll.u32 %s980_s12, 4  ;;  %s64_s16 = sshll.u32 %s1442_s4, 4  ;;  %s39_s13 = int_to_ptr.vmem [resolvable:$true] %s38_s13  ;;  %s65_s16 = int_to_ptr.hbm [resolvable:$true] %s64_s16 }
   0x6   :  { %s981_s17 = smov 128   ;;  %s982_s18 = smov 8  }
   0x7   :  { %44 = dma.hbm_to_vmem [thread:$0]  %s37_s11, 2048, %s39_s13, [#allocation7], %s981_s17, %s981_s17, %s982_s18  }
   0x8   :  { %s983_s19 = smov [#allocation9]   ;;  %s23_s1 = sshll.u32 %s1438_s0, 4  ;;  %s24_s1 = int_to_ptr.hbm [resolvable:$true] %s23_s1 }
   0x9   :  { %s66_s20 = sshll.u32 %s983_s19, 4  ;;  %s49_s24 = sshll.u32 %s1440_s2, 4  ;;  %s67_s20 = int_to_ptr.vmem [resolvable:$true] %s66_s20  ;;  %s50_s24 = int_to_ptr.hbm [resolvable:$true] %s49_s24 }
   0xa   :  { %72 = dma.hbm_to_vmem [thread:$0]  %s65_s16, 2048, %s67_s20, [#allocation10], %s981_s17, %s981_s17, %s982_s18  }
   0xb   :  { %s984_s25 = smov [#allocation3]   ;;  %s985_s27 = smov [#allocation8]  }
   0xc   :  { %s25_s26 = sshll.u32 %s984_s25, 4  ;;  %s51_s0 = sshll.u32 %s985_s27, 4  ;;  %s26_s26 = int_to_ptr.vmem [resolvable:$true] %s25_s26  ;;  %s52_s0 = int_to_ptr.vmem [resolvable:$true] %s51_s0 }
   0xd   :  { %31 = dma.hbm_to_vmem [thread:$0]  %s24_s1, 1024, %s26_s26, [#allocation4], %s981_s17, %s981_s17, %s982_s18  }
   0xe   :  { %s77_s30 = sshll.u32 %s1443_s5, 4  ;;  %s92_s11 = sshll.u32 %s1445_s7, 4  ;;  %s78_s30 = int_to_ptr.hbm [resolvable:$true] %s77_s30  ;;  %s93_s11 = int_to_ptr.hbm [resolvable:$true] %s92_s11 }
   0xf   :  { %57 = dma.hbm_to_vmem [thread:$0]  %s50_s24, 2048, %s52_s0, [#allocation7], %s981_s17, %s981_s17, %s982_s18  }
  0x10   :  { %s986_s12 = smov [#allocation11]   ;;  %s987_s14 = smov [#allocation12]  }
  0x11   :  { %s79_s13 = sshll.u32 %s986_s12, 4  ;;  %s94_s5 = sshll.u32 %s987_s14, 4  ;;  %s80_s13 = int_to_ptr.vmem [resolvable:$true] %s79_s13  ;;  %s95_s5 = int_to_ptr.vmem [resolvable:$true] %s94_s5 }
  0x12   :  { %85 = dma.hbm_to_vmem [thread:$0]  %s78_s30, 2048, %s80_s13, [#allocation10], %s981_s17, %s981_s17, %s982_s18  }
  0x13   :  { %100 = dma.hbm_to_vmem [thread:$0]  %s93_s11, 2048, %s95_s5, [#allocation13], %s981_s17, %s981_s17, %s982_s18  }
  0x14   :  { %970 = dma.done.wait [#allocation4], 1024  }
  0x15   :  { %971 = vsyncadd [#allocation4], 4294966272 }
  0x16   :  { %972 = dma.done.wait [#allocation7], 4096  }
  0x17   :  { %973 = vsyncadd [#allocation7], 4294963200 }
  0x18   :  { %974 = dma.done.wait [#allocation10], 4096  }
  0x19   :  { %975 = vsyncadd [#allocation10], 4294963200 }
  0x1a   :  { %976 = dma.done.wait [#allocation13], 2048  }
  0x1b   :  { %977 = vsyncadd [#allocation13], 4294965248  ;;  %v150_v0 = vld [vmem:[#allocation6 + $0x78] sm:$0xff]  ;;  %v149_v1 = vld [vmem:[#allocation6 + $0x70] sm:$0xff]  ;;  %v988_v33 = vmov 0.0   ;;  %s989_s18 = smov [#allocation14]  }
  0x1c   :  { %v1076_v2 = vld [vmem:[#allocation8 + $0x78] sm:$0xff]  ;;  %155 = vmatpush.msra.mxu0 %v150_v0  ;;  %v1079_v3 = vld [vmem:[#allocation8 + $0x70] sm:$0xff]  ;;  %v148_v4 = vld [vmem:[#allocation6 + $0x68] sm:$0xff]  ;;  %s742_s19 = sshll.u32 %s989_s18, 4  ;;  %s744_s22 = sshll.u32 %s1447_s9, 4  ;;  %s743_s19 = int_to_ptr.vmem [resolvable:$true] %s742_s19  ;;  %s745_s22 = int_to_ptr.hbm [resolvable:$true] %s744_s22 }
  0x1d   :  { %221 = vmatpush.msra.mxu1 %v1076_v2  ;;  %v1081_v5 = vld [vmem:[#allocation8 + $0x68] sm:$0xff]  ;;  %246 = vmatpush.msra.mxu2 %v1076_v2  ;;  %v147_v6 = vld [vmem:[#allocation6 + $0x60] sm:$0xff]  ;;  %v146_v8 = vld [vmem:[#allocation6 + $0x58] sm:$0xff] }
  0x1e   :  { %271 = vmatpush.msra.mxu3 %v1076_v2  ;;  %156 = vmatpush.msra.mxu0 %v149_v1  ;;  %v1086_v7 = vld [vmem:[#allocation8 + $0x60] sm:$0xff]  ;;  %v1091_v9 = vld [vmem:[#allocation8 + $0x58] sm:$0xff]  ;;  %v145_v10 = vld [vmem:[#allocation6 + $0x50] sm:$0xff] }
  0x1f   :  { %222 = vmatpush.msra.mxu1 %v1079_v3  ;;  %247 = vmatpush.msra.mxu2 %v1079_v3  ;;  %v1096_v11 = vld [vmem:[#allocation8 + $0x50] sm:$0xff]  ;;  %v144_v12 = vld [vmem:[#allocation6 + $0x48] sm:$0xff]  ;;  %v143_v14 = vld [vmem:[#allocation6 + $0x40] sm:$0xff] }
  0x20   :  { %272 = vmatpush.msra.mxu3 %v1079_v3  ;;  %157 = vmatpush.msra.mxu0 %v148_v4  ;;  %v1101_v13 = vld [vmem:[#allocation8 + $0x48] sm:$0xff]  ;;  %v1106_v15 = vld [vmem:[#allocation8 + $0x40] sm:$0xff]  ;;  %v142_v16 = vld [vmem:[#allocation6 + $0x38] sm:$0xff] }
  0x21   :  { %223 = vmatpush.msra.mxu1 %v1081_v5  ;;  %248 = vmatpush.msra.mxu2 %v1081_v5  ;;  %v1111_v17 = vld [vmem:[#allocation8 + $0x38] sm:$0xff]  ;;  %v141_v18 = vld [vmem:[#allocation6 + $0x30] sm:$0xff]  ;;  %v140_v20 = vld [vmem:[#allocation6 + $0x28] sm:$0xff] }
  0x22   :  { %273 = vmatpush.msra.mxu3 %v1081_v5  ;;  %158 = vmatpush.msra.mxu0 %v147_v6  ;;  %v1116_v19 = vld [vmem:[#allocation8 + $0x30] sm:$0xff]  ;;  %v1121_v21 = vld [vmem:[#allocation8 + $0x28] sm:$0xff]  ;;  %v139_v22 = vld [vmem:[#allocation6 + $0x20] sm:$0xff] }
  0x23   :  { %224 = vmatpush.msra.mxu1 %v1086_v7  ;;  %249 = vmatpush.msra.mxu2 %v1086_v7  ;;  %v1126_v23 = vld [vmem:[#allocation8 + $0x20] sm:$0xff]  ;;  %v138_v24 = vld [vmem:[#allocation6 + $0x18] sm:$0xff]  ;;  %v137_v26 = vld [vmem:[#allocation6 + $0x10] sm:$0xff] }
  0x24   :  { %274 = vmatpush.msra.mxu3 %v1086_v7  ;;  %159 = vmatpush.msra.mxu0 %v146_v8  ;;  %v1131_v25 = vld [vmem:[#allocation8 + $0x18] sm:$0xff]  ;;  %v1136_v27 = vld [vmem:[#allocation8 + $0x10] sm:$0xff]  ;;  %v136_v28 = vld [vmem:[#allocation6 + $0x8] sm:$0xff] }
  0x25   :  { %225 = vmatpush.msra.mxu1 %v1091_v9  ;;  %250 = vmatpush.msra.mxu2 %v1091_v9  ;;  %v1141_v29 = vld [vmem:[#allocation8 + $0x8] sm:$0xff]  ;;  %v135_v30 = vld [vmem:[#allocation6] sm:$0xff]  ;;  %v129_v41 = vld [vmem:[#allocation3 + $0x10] sm:$0xff] }
  0x26   :  { %275 = vmatpush.msra.mxu3 %v1091_v9  ;;  %160 = vmatpush.msra.mxu0 %v145_v10  ;;  %v1146_v31 = vld [vmem:[#allocation8] sm:$0xff]  ;;  %v128_v34 = vld [vmem:[#allocation3 + $0x8] sm:$0xff]  ;;  %v130_v47 = vld [vmem:[#allocation3 + $0x18] sm:$0xff] }
  0x27   :  { %226 = vmatpush.msra.mxu1 %v1096_v11  ;;  %251 = vmatpush.msra.mxu2 %v1096_v11  ;;  %v127_v32 = vld [vmem:[#allocation3] sm:$0xff]  ;;  %v442_v48 = vld [vmem:[#allocation9 + $0x78] sm:$0xff]  ;;  %v441_v49 = vld [vmem:[#allocation9 + $0x70] sm:$0xff] }
  0x28   :  { %276 = vmatpush.msra.mxu3 %v1096_v11  ;;  %161 = vmatpush.msra.mxu0 %v144_v12  ;;  %v1240_v35 = vld [vmem:[%s1441_s3] ss:$0 sm:$0xff]  ;;  %v440_v50 = vld [vmem:[#allocation9 + $0x68] sm:$0xff]  ;;  %v438_v52 = vld [vmem:[#allocation9 + $0x58] sm:$0xff] }
  0x29   :  { %227 = vmatpush.msra.mxu1 %v1101_v13  ;;  %252 = vmatpush.msra.mxu2 %v1101_v13  ;;  %v439_v51 = vld [vmem:[#allocation9 + $0x60] sm:$0xff]  ;;  %v437_v53 = vld [vmem:[#allocation9 + $0x50] sm:$0xff]  ;;  %v436_v59 = vld [vmem:[#allocation9 + $0x48] sm:$0xff] }
  0x2a   :  { %277 = vmatpush.msra.mxu3 %v1101_v13  ;;  %162 = vmatpush.msra.mxu0 %v143_v14  ;;  %v435_v60 = vld [vmem:[#allocation9 + $0x40] sm:$0xff]  ;;  %v434_v61 = vld [vmem:[#allocation9 + $0x38] sm:$0xff]  ;;  %v433_v62 = vld [vmem:[#allocation9 + $0x30] sm:$0xff] }
  0x2b   :  { %228 = vmatpush.msra.mxu1 %v1106_v15  ;;  %253 = vmatpush.msra.mxu2 %v1106_v15  ;;  %v432_v63 = vld [vmem:[#allocation9 + $0x28] sm:$0xff]  ;;  %v431_v0 = vld [vmem:[#allocation9 + $0x20] sm:$0xff]  ;;  %v430_v1 = vld [vmem:[#allocation9 + $0x18] sm:$0xff] }
  0x2c   :  { %278 = vmatpush.msra.mxu3 %v1106_v15  ;;  %163 = vmatpush.msra.mxu0 %v142_v16  ;;  %v428_v4 = vld [vmem:[#allocation9 + $0x8] sm:$0xff]  ;;  %v1254_v12 = vld [vmem:[#allocation11 + $0x70] sm:$0xff]  ;;  %v1264_v14 = vld [vmem:[#allocation11 + $0x60] sm:$0xff] }
  0x2d   :  { %229 = vmatpush.msra.mxu1 %v1111_v17  ;;  %254 = vmatpush.msra.mxu2 %v1111_v17  ;;  %v1277_v16 = vld [vmem:[#allocation11 + $0x50] sm:$0xff] }
  0x2e   :  { %279 = vmatpush.msra.mxu3 %v1111_v17  ;;  %164 = vmatpush.msra.mxu0 %v141_v18  ;;  %v1296_v18 = vld [vmem:[#allocation11 + $0x40] sm:$0xff] }
  0x2f   :  { %230 = vmatpush.msra.mxu1 %v1116_v19  ;;  %255 = vmatpush.msra.mxu2 %v1116_v19 }
  0x30   :  { %280 = vmatpush.msra.mxu3 %v1116_v19  ;;  %165 = vmatpush.msra.mxu0 %v140_v20  ;;  %v1305_v20 = vld [vmem:[#allocation11 + $0x30] sm:$0xff] }
  0x31   :  { %231 = vmatpush.msra.mxu1 %v1121_v21  ;;  %256 = vmatpush.msra.mxu2 %v1121_v21 }
  0x32   :  { %281 = vmatpush.msra.mxu3 %v1121_v21  ;;  %166 = vmatpush.msra.mxu0 %v139_v22  ;;  %v1318_v22 = vld [vmem:[#allocation11 + $0x20] sm:$0xff] }
  0x33   :  { %232 = vmatpush.msra.mxu1 %v1126_v23  ;;  %257 = vmatpush.msra.mxu2 %v1126_v23 }
  0x34   :  { %282 = vmatpush.msra.mxu3 %v1126_v23  ;;  %167 = vmatpush.msra.mxu0 %v138_v24  ;;  %v1326_v24 = vld [vmem:[#allocation11 + $0x10] sm:$0xff] }
  0x35   :  { %233 = vmatpush.msra.mxu1 %v1131_v25  ;;  %258 = vmatpush.msra.mxu2 %v1131_v25 }
  0x36   :  { %283 = vmatpush.msra.mxu3 %v1131_v25  ;;  %168 = vmatpush.msra.mxu0 %v137_v26  ;;  %v1331_v26 = vld [vmem:[#allocation11 + $0x8] sm:$0xff] }
  0x37   :  { %234 = vmatpush.msra.mxu1 %v1136_v27  ;;  %259 = vmatpush.msra.mxu2 %v1136_v27 }
  0x38   :  { %284 = vmatpush.msra.mxu3 %v1136_v27  ;;  %169 = vmatpush.msra.mxu0 %v136_v28 }
  0x39   :  { %235 = vmatpush.msra.mxu1 %v1141_v29  ;;  %260 = vmatpush.msra.mxu2 %v1141_v29 }
  0x3a   :  { %285 = vmatpush.msra.mxu3 %v1141_v29  ;;  %170 = vmatpush.msra.mxu0 %v135_v30 }
  0x3b   :  { %236 = vmatpush.msra.mxu1 %v1146_v31  ;;  %171 = vmatmul.f32.vlgmr.msra.gmra.mxu0 %v127_v32  ;;  %v133_v32 = vld [vmem:[#allocation3 + $0x30] sm:$0xff] }
  0x3c   :  { %237 = vmatmul.f32.vlgmr.msra.gmra.mxu1 %v988_v33  ;;  %261 = vmatpush.msra.mxu2 %v1146_v31 }
  0x3d   :  { %286 = vmatpush.msra.mxu3 %v1146_v31  ;;  %296 = vmatpush.msrb.mxu1 %v1076_v2 }
  0x3e   :  { %321 = vmatpush.msrb.mxu2 %v1076_v2  ;;  %371 = vmatpush.msrb.mxu0 %v1076_v2 }
  0x3f   :  { %346 = vmatpush.msrb.mxu3 %v1076_v2  ;;  %297 = vmatpush.msrb.mxu1 %v1079_v3 }
  0x40   :  { %322 = vmatpush.msrb.mxu2 %v1079_v3  ;;  %372 = vmatpush.msrb.mxu0 %v1079_v3 }
  0x41   :  { %347 = vmatpush.msrb.mxu3 %v1079_v3  ;;  %298 = vmatpush.msrb.mxu1 %v1081_v5 }
  0x42   :  { %323 = vmatpush.msrb.mxu2 %v1081_v5  ;;  %373 = vmatpush.msrb.mxu0 %v1081_v5 }
  0x43   :  { %348 = vmatpush.msrb.mxu3 %v1081_v5  ;;  %299 = vmatpush.msrb.mxu1 %v1086_v7 }
  0x44   :  { %324 = vmatpush.msrb.mxu2 %v1086_v7  ;;  %374 = vmatpush.msrb.mxu0 %v1086_v7 }
  0x45   :  { %349 = vmatpush.msrb.mxu3 %v1086_v7  ;;  %300 = vmatpush.msrb.mxu1 %v1091_v9 }
  0x46   :  { %325 = vmatpush.msrb.mxu2 %v1091_v9  ;;  %375 = vmatpush.msrb.mxu0 %v1091_v9 }
  0x47   :  { %350 = vmatpush.msrb.mxu3 %v1091_v9  ;;  %301 = vmatpush.msrb.mxu1 %v1096_v11 }
  0x48   :  { %326 = vmatpush.msrb.mxu2 %v1096_v11  ;;  %376 = vmatpush.msrb.mxu0 %v1096_v11 }
  0x49   :  { %351 = vmatpush.msrb.mxu3 %v1096_v11  ;;  %302 = vmatpush.msrb.mxu1 %v1101_v13 }
  0x4a   :  { %327 = vmatpush.msrb.mxu2 %v1101_v13  ;;  %377 = vmatpush.msrb.mxu0 %v1101_v13 }
  0x4b   :  { %352 = vmatpush.msrb.mxu3 %v1101_v13  ;;  %303 = vmatpush.msrb.mxu1 %v1106_v15 }
  0x4c   :  { %328 = vmatpush.msrb.mxu2 %v1106_v15  ;;  %378 = vmatpush.msrb.mxu0 %v1106_v15 }
  0x4d   :  { %353 = vmatpush.msrb.mxu3 %v1106_v15  ;;  %304 = vmatpush.msrb.mxu1 %v1111_v17 }
  0x4e   :  { %329 = vmatpush.msrb.mxu2 %v1111_v17  ;;  %379 = vmatpush.msrb.mxu0 %v1111_v17 }
  0x4f   :  { %354 = vmatpush.msrb.mxu3 %v1111_v17  ;;  %305 = vmatpush.msrb.mxu1 %v1116_v19 }
  0x50   :  { %330 = vmatpush.msrb.mxu2 %v1116_v19  ;;  %380 = vmatpush.msrb.mxu0 %v1116_v19 }
  0x51   :  { %355 = vmatpush.msrb.mxu3 %v1116_v19  ;;  %306 = vmatpush.msrb.mxu1 %v1121_v21 }
  0x52   :  { %331 = vmatpush.msrb.mxu2 %v1121_v21  ;;  %381 = vmatpush.msrb.mxu0 %v1121_v21 }
  0x53   :  { %356 = vmatpush.msrb.mxu3 %v1121_v21  ;;  %307 = vmatpush.msrb.mxu1 %v1126_v23 }
  0x54   :  { %332 = vmatpush.msrb.mxu2 %v1126_v23  ;;  %382 = vmatpush.msrb.mxu0 %v1126_v23 }
  0x55   :  { %357 = vmatpush.msrb.mxu3 %v1126_v23  ;;  %308 = vmatpush.msrb.mxu1 %v1131_v25 }
  0x56   :  { %333 = vmatpush.msrb.mxu2 %v1131_v25  ;;  %383 = vmatpush.msrb.mxu0 %v1131_v25 }
  0x57   :  { %358 = vmatpush.msrb.mxu3 %v1131_v25  ;;  %309 = vmatpush.msrb.mxu1 %v1136_v27 }
  0x58   :  { %334 = vmatpush.msrb.mxu2 %v1136_v27  ;;  %384 = vmatpush.msrb.mxu0 %v1136_v27 }
  0x59   :  { %359 = vmatpush.msrb.mxu3 %v1136_v27  ;;  %310 = vmatpush.msrb.mxu1 %v1141_v29 }
  0x5a   :  { %335 = vmatpush.msrb.mxu2 %v1141_v29  ;;  %385 = vmatpush.msrb.mxu0 %v1141_v29 }
  0x5b   :  { %360 = vmatpush.msrb.mxu3 %v1141_v29  ;;  %311 = vmatpush.msrb.mxu1 %v1146_v31 }
  0x5c   :  { %336 = vmatpush.msrb.mxu2 %v1146_v31  ;;  %386 = vmatpush.msrb.mxu0 %v1146_v31 }
  0x5d   :  { %361 = vmatpush.msrb.mxu3 %v1146_v31  ;;  %396 = vmatpush.msra.mxu1 %v1076_v2  ;;  %v429_v2 = vld [vmem:[#allocation9 + $0x10] sm:$0xff] }
  0x5e   :  { %174 = vmatmul.f32.gmra.mxu0 %v128_v34 }
  0x5f   :  { %397 = vmatpush.msra.mxu1 %v1079_v3  ;;  %v131_v3 = vld [vmem:[#allocation3 + $0x20] sm:$0xff] }
  0x61   :  { %398 = vmatpush.msra.mxu1 %v1081_v5  ;;  %v427_v5 = vld [vmem:[#allocation9] sm:$0xff] }
  0x63   :  { %399 = vmatpush.msra.mxu1 %v1086_v7 }
  0x65   :  { %400 = vmatpush.msra.mxu1 %v1091_v9 }
  0x66   :  { %177 = vmatmul.f32.gmra.mxu0 %v129_v41 }
  0x67   :  { %401 = vmatpush.msra.mxu1 %v1096_v11  ;;  %v1252_v11 = vld [vmem:[#allocation11 + $0x78] sm:$0xff] }
  0x68   :  { %536 = vmatpush.msra.mxu0 %v1252_v11 }
  0x69   :  { %402 = vmatpush.msra.mxu1 %v1101_v13  ;;  %v1258_v13 = vld [vmem:[#allocation11 + $0x68] sm:$0xff] }
  0x6a   :  { %537 = vmatpush.msra.mxu0 %v1254_v12 }
  0x6b   :  { %403 = vmatpush.msra.mxu1 %v1106_v15  ;;  %v1270_v15 = vld [vmem:[#allocation11 + $0x58] sm:$0xff] }
  0x6c   :  { %538 = vmatpush.msra.mxu0 %v1258_v13 }
  0x6d   :  { %404 = vmatpush.msra.mxu1 %v1111_v17  ;;  %v1290_v17 = vld [vmem:[#allocation11 + $0x48] sm:$0xff] }
  0x6e   :  { %180 = vmatmul.f32.gmra.mxu0 %v130_v47 }
  0x6f   :  { %405 = vmatpush.msra.mxu1 %v1116_v19  ;;  %539 = vmatpush.msra.mxu0 %v1264_v14  ;;  %v1300_v19 = vld [vmem:[#allocation11 + $0x38] sm:$0xff] }
  0x71   :  { %406 = vmatpush.msra.mxu1 %v1121_v21  ;;  %540 = vmatpush.msra.mxu0 %v1270_v15  ;;  %v1308_v21 = vld [vmem:[#allocation11 + $0x28] sm:$0xff] }
  0x73   :  { %407 = vmatpush.msra.mxu1 %v1126_v23  ;;  %541 = vmatpush.msra.mxu0 %v1277_v16  ;;  %v1324_v23 = vld [vmem:[#allocation11 + $0x18] sm:$0xff] }
  0x75   :  { %408 = vmatpush.msra.mxu1 %v1131_v25  ;;  %542 = vmatpush.msra.mxu0 %v1290_v17  ;;  %v132_v25 = vld [vmem:[#allocation3 + $0x28] sm:$0xff] }
  0x76   :  { %183 = vmatmul.f32.gmra.mxu0 %v131_v3 }
  0x77   :  { %409 = vmatpush.msra.mxu1 %v1136_v27  ;;  %543 = vmatpush.msra.mxu0 %v1296_v18  ;;  %v1341_v27 = vld [vmem:[#allocation11] sm:$0xff] }
  0x79   :  { %410 = vmatpush.msra.mxu1 %v1141_v29  ;;  %544 = vmatpush.msra.mxu0 %v1300_v19 }
  0x7b   :  { %411 = vmatpush.msra.mxu1 %v1146_v31  ;;  %545 = vmatpush.msra.mxu0 %v1305_v20 }
  0x7d   :  { %546 = vmatpush.msra.mxu0 %v1308_v21 }
  0x7e   :  { %186 = vmatmul.f32.gmra.mxu0 %v132_v25  ;;  %v704_v25 = vld [vmem:[#allocation12 + $0x40] sm:$0xff] }
  0x7f   :  { %547 = vmatpush.msra.mxu0 %v1318_v22 }
  0x81   :  { %548 = vmatpush.msra.mxu0 %v1324_v23 }
  0x83   :  { %549 = vmatpush.msra.mxu0 %v1326_v24 }
  0x85   :  { %550 = vmatpush.msra.mxu0 %v1331_v26 }
  0x86   :  { %189 = vmatmul.f32.gmra.mxu0 %v133_v32 }
  0x87   :  { %551 = vmatpush.msra.mxu0 %v1341_v27 }
  0xb8   :  { %v172_v36 = vpop.f32.mrf.mxu0 }
  0xb9   :  { %v238_v37 = vpop.f32.mrf.mxu1  ;;  %v173_v38 = vadd.f32 %v1240_v35, %v172_v36 }
  0xbb   :  { %v241_v39 = vadd.f32 %v238_v37, %v173_v38 }
  0xbd   :  { %770 = vtanh.f32 %v241_v39 }
  0xc3   :  { %v1243_v40 = vpop.eup %770 }
  0xc4   :  { %262 = vmatmul.f32.vlgmr.msra.gmra.mxu2 %v1243_v40 }
  0xc5   :  { %447 = vmatpush.msra.mxu2 %v442_v48 }
  0xc7   :  { %448 = vmatpush.msra.mxu2 %v441_v49 }
  0xc9   :  { %449 = vmatpush.msra.mxu2 %v440_v50 }
  0xcb   :  { %450 = vmatpush.msra.mxu2 %v439_v51 }
  0xcd   :  { %451 = vmatpush.msra.mxu2 %v438_v52 }
  0xcf   :  { %452 = vmatpush.msra.mxu2 %v437_v53 }
  0xd1   :  { %453 = vmatpush.msra.mxu2 %v436_v59 }
  0xd3   :  { %454 = vmatpush.msra.mxu2 %v435_v60 }
  0xd5   :  { %455 = vmatpush.msra.mxu2 %v434_v61 }
  0xd7   :  { %456 = vmatpush.msra.mxu2 %v433_v62 }
  0xd9   :  { %457 = vmatpush.msra.mxu2 %v432_v63 }
  0xdb   :  { %v175_v42 = vpop.f32.mrf.mxu0  ;;  %458 = vmatpush.msra.mxu2 %v431_v0 }
  0xdc   :  { %v176_v43 = vadd.f32 %v1240_v35, %v175_v42 }
  0xdd   :  { %459 = vmatpush.msra.mxu2 %v430_v1 }
  0xdf   :  { %460 = vmatpush.msra.mxu2 %v429_v2 }
  0xe1   :  { %461 = vmatpush.msra.mxu2 %v428_v4 }
  0xe3   :  { %v178_v54 = vpop.f32.mrf.mxu0  ;;  %462 = vmatpush.msra.mxu2 %v427_v5 }
  0xe4   :  { %v179_v55 = vadd.f32 %v1240_v35, %v178_v54 }
  0xeb   :  { %v181_v6 = vpop.f32.mrf.mxu0 }
  0xec   :  { %v182_v7 = vadd.f32 %v1240_v35, %v181_v6 }
  0xf3   :  { %v184_v28 = vpop.f32.mrf.mxu0 }
  0xf4   :  { %v185_v29 = vadd.f32 %v1240_v35, %v184_v28  ;;  %v702_v28 = vld [vmem:[#allocation12 + $0x30] sm:$0xff] }
  0xfb   :  { %v187_v36 = vpop.f32.mrf.mxu0 }
  0xfc   :  { %v188_v37 = vadd.f32 %v1240_v35, %v187_v36  ;;  %v699_v36 = vld [vmem:[#allocation12 + $0x18] sm:$0xff] }
 0x103   :  { %v190_v47 = vpop.f32.mrf.mxu0 }
 0x104   :  { %v191_v49 = vadd.f32 %v1240_v35, %v190_v47 }
 0x147   :  { %v263_v44 = vpop.f32.mrf.mxu2 }
 0x148   :  { %v266_v45 = vadd.f32 %v263_v44, %v176_v43 }
 0x14a   :  { %772 = vtanh.f32 %v266_v45 }
 0x150   :  { %v1247_v46 = vpop.eup %772 }
 0x151   :  { %287 = vmatmul.f32.vlgmr.msra.gmra.mxu3 %v1247_v46 }
 0x152   :  { %513 = vmatpush.msra.mxu3 %v1252_v11 }
 0x154   :  { %514 = vmatpush.msra.mxu3 %v1254_v12 }
 0x156   :  { %515 = vmatpush.msra.mxu3 %v1258_v13 }
 0x158   :  { %516 = vmatpush.msra.mxu3 %v1264_v14 }
 0x15a   :  { %517 = vmatpush.msra.mxu3 %v1270_v15 }
 0x15c   :  { %518 = vmatpush.msra.mxu3 %v1277_v16 }
 0x15e   :  { %519 = vmatpush.msra.mxu3 %v1290_v17 }
 0x160   :  { %520 = vmatpush.msra.mxu3 %v1296_v18 }
 0x162   :  { %521 = vmatpush.msra.mxu3 %v1300_v19 }
 0x164   :  { %522 = vmatpush.msra.mxu3 %v1305_v20 }
 0x166   :  { %523 = vmatpush.msra.mxu3 %v1308_v21 }
 0x168   :  { %524 = vmatpush.msra.mxu3 %v1318_v22 }
 0x16a   :  { %525 = vmatpush.msra.mxu3 %v1324_v23 }
 0x16c   :  { %526 = vmatpush.msra.mxu3 %v1326_v24 }
 0x16e   :  { %527 = vmatpush.msra.mxu3 %v1331_v26 }
 0x170   :  { %528 = vmatpush.msra.mxu3 %v1341_v27 }
 0x1d4   :  { %v288_v56 = vpop.f32.mrf.mxu3 }
 0x1d5   :  { %v291_v57 = vadd.f32 %v288_v56, %v179_v55 }
 0x1d7   :  { %774 = vtanh.f32 %v291_v57 }
 0x1dd   :  { %v775_v58 = vpop.eup %774 }
 0x1de   :  { %312 = vmatmul.f32.vlgmr.msrb.gmra.mxu1 %v775_v58 }
 0x1df   :  { %559 = vmatpush.msrb.mxu1 %v1252_v11 }
 0x1e1   :  { %560 = vmatpush.msrb.mxu1 %v1254_v12 }
 0x1e3   :  { %561 = vmatpush.msrb.mxu1 %v1258_v13 }
 0x1e5   :  { %562 = vmatpush.msrb.mxu1 %v1264_v14 }
 0x1e7   :  { %563 = vmatpush.msrb.mxu1 %v1270_v15 }
 0x1e9   :  { %564 = vmatpush.msrb.mxu1 %v1277_v16 }
 0x1eb   :  { %565 = vmatpush.msrb.mxu1 %v1290_v17 }
 0x1ed   :  { %566 = vmatpush.msrb.mxu1 %v1296_v18 }
 0x1ef   :  { %567 = vmatpush.msrb.mxu1 %v1300_v19 }
 0x1f1   :  { %568 = vmatpush.msrb.mxu1 %v1305_v20 }
 0x1f3   :  { %569 = vmatpush.msrb.mxu1 %v1308_v21 }
 0x1f5   :  { %570 = vmatpush.msrb.mxu1 %v1318_v22 }
 0x1f7   :  { %571 = vmatpush.msrb.mxu1 %v1324_v23 }
 0x1f9   :  { %572 = vmatpush.msrb.mxu1 %v1326_v24 }
 0x1fb   :  { %573 = vmatpush.msrb.mxu1 %v1331_v26 }
 0x1fd   :  { %574 = vmatpush.msrb.mxu1 %v1341_v27 }
 0x25b   :  { %v313_v8 = vpop.f32.mrf.mxu1 }
 0x25c   :  { %v316_v9 = vadd.f32 %v313_v8, %v182_v7 }
 0x25e   :  { %776 = vtanh.f32 %v316_v9 }
 0x264   :  { %v777_v10 = vpop.eup %776 }
 0x265   :  { %337 = vmatmul.f32.vlgmr.msrb.gmra.mxu2 %v777_v10 }
 0x266   :  { %651 = vmatpush.msrb.mxu2 %v1252_v11 }
 0x268   :  { %652 = vmatpush.msrb.mxu2 %v1254_v12 }
 0x26a   :  { %653 = vmatpush.msrb.mxu2 %v1258_v13 }
 0x26c   :  { %654 = vmatpush.msrb.mxu2 %v1264_v14 }
 0x26d   :  { %463 = vmatmul.f32.vlgmr.msra.gmra.mxu2 %v1243_v40  ;;  %v1388_v40 = vld [vmem:[%s1444_s6] ss:$0 sm:$0xff] }
 0x26e   :  { %655 = vmatpush.msrb.mxu2 %v1270_v15 }
 0x270   :  { %656 = vmatpush.msrb.mxu2 %v1277_v16 }
 0x272   :  { %657 = vmatpush.msrb.mxu2 %v1290_v17 }
 0x274   :  { %658 = vmatpush.msrb.mxu2 %v1296_v18 }
 0x275   :  { %466 = vmatmul.f32.gmra.mxu2 %v1247_v46 }
 0x276   :  { %659 = vmatpush.msrb.mxu2 %v1300_v19 }
 0x278   :  { %660 = vmatpush.msrb.mxu2 %v1305_v20 }
 0x27a   :  { %661 = vmatpush.msrb.mxu2 %v1308_v21 }
 0x27c   :  { %662 = vmatpush.msrb.mxu2 %v1318_v22 }
 0x27d   :  { %469 = vmatmul.f32.gmra.mxu2 %v775_v58 }
 0x27e   :  { %663 = vmatpush.msrb.mxu2 %v1324_v23 }
 0x280   :  { %664 = vmatpush.msrb.mxu2 %v1326_v24 }
 0x282   :  { %665 = vmatpush.msrb.mxu2 %v1331_v26 }
 0x284   :  { %666 = vmatpush.msrb.mxu2 %v1341_v27 }
 0x285   :  { %472 = vmatmul.f32.gmra.mxu2 %v777_v10 }
 0x2e8   :  { %v338_v30 = vpop.f32.mrf.mxu2 }
 0x2e9   :  { %v341_v31 = vadd.f32 %v338_v30, %v185_v29  ;;  %v701_v29 = vld [vmem:[#allocation12 + $0x28] sm:$0xff] }
 0x2eb   :  { %778 = vtanh.f32 %v341_v31 }
 0x2f0   :  { %v464_v41 = vpop.f32.mrf.mxu2 }
 0x2f1   :  { %v779_v34 = vpop.eup %778  ;;  %v465_v42 = vadd.f32 %v1388_v40, %v464_v41 }
 0x2f2   :  { %362 = vmatmul.f32.vlgmr.msrb.gmra.mxu3 %v779_v34  ;;  %475 = vmatmul.f32.gmra.mxu2 %v779_v34 }
 0x2f3   :  { %582 = vmatpush.msrb.mxu3 %v1252_v11 }
 0x2f5   :  { %583 = vmatpush.msrb.mxu3 %v1254_v12 }
 0x2f7   :  { %584 = vmatpush.msrb.mxu3 %v1258_v13 }
 0x2f8   :  { %v467_v52 = vpop.f32.mrf.mxu2 }
 0x2f9   :  { %585 = vmatpush.msrb.mxu3 %v1264_v14  ;;  %v468_v53 = vadd.f32 %v1388_v40, %v467_v52 }
 0x2fa   :  { %529 = vmatmul.f32.vlgmr.msra.gmra.mxu3 %v988_v33  ;;  %v134_v33 = vld [vmem:[#allocation3 + $0x38] sm:$0xff] }
 0x2fb   :  { %586 = vmatpush.msrb.mxu3 %v1270_v15  ;;  %192 = vmatmul.f32.gmra.mxu0 %v134_v33  ;;  %v700_v33 = vld [vmem:[#allocation12 + $0x20] sm:$0xff] }
 0x2fd   :  { %587 = vmatpush.msrb.mxu3 %v1277_v16 }
 0x2ff   :  { %588 = vmatpush.msrb.mxu3 %v1290_v17 }
 0x300   :  { %v470_v61 = vpop.f32.mrf.mxu2 }
 0x301   :  { %589 = vmatpush.msrb.mxu3 %v1296_v18  ;;  %v471_v62 = vadd.f32 %v1388_v40, %v470_v61 }
 0x303   :  { %590 = vmatpush.msrb.mxu3 %v1300_v19 }
 0x305   :  { %591 = vmatpush.msrb.mxu3 %v1305_v20 }
 0x307   :  { %592 = vmatpush.msrb.mxu3 %v1308_v21 }
 0x308   :  { %v473_v3 = vpop.f32.mrf.mxu2 }
 0x309   :  { %593 = vmatpush.msrb.mxu3 %v1318_v22  ;;  %v474_v4 = vadd.f32 %v1388_v40, %v473_v3 }
 0x30b   :  { %594 = vmatpush.msrb.mxu3 %v1324_v23 }
 0x30d   :  { %595 = vmatpush.msrb.mxu3 %v1326_v24 }
 0x30f   :  { %596 = vmatpush.msrb.mxu3 %v1331_v26 }
 0x311   :  { %597 = vmatpush.msrb.mxu3 %v1341_v27 }
 0x313   :  { %674 = vmatpush.msra.mxu3 %v1252_v11 }
 0x315   :  { %675 = vmatpush.msra.mxu3 %v1254_v12 }
 0x317   :  { %676 = vmatpush.msra.mxu3 %v1258_v13 }
 0x319   :  { %677 = vmatpush.msra.mxu3 %v1264_v14 }
 0x31b   :  { %678 = vmatpush.msra.mxu3 %v1270_v15 }
 0x31d   :  { %679 = vmatpush.msra.mxu3 %v1277_v16 }
 0x31f   :  { %680 = vmatpush.msra.mxu3 %v1290_v17 }
 0x321   :  { %681 = vmatpush.msra.mxu3 %v1296_v18 }
 0x323   :  { %682 = vmatpush.msra.mxu3 %v1300_v19 }
 0x325   :  { %683 = vmatpush.msra.mxu3 %v1305_v20 }
 0x327   :  { %684 = vmatpush.msra.mxu3 %v1308_v21 }
 0x329   :  { %685 = vmatpush.msra.mxu3 %v1318_v22 }
 0x32b   :  { %686 = vmatpush.msra.mxu3 %v1324_v23 }
 0x32d   :  { %687 = vmatpush.msra.mxu3 %v1326_v24 }
 0x32f   :  { %688 = vmatpush.msra.mxu3 %v1331_v26 }
 0x331   :  { %689 = vmatpush.msra.mxu3 %v1341_v27 }
 0x375   :  { %v363_v38 = vpop.f32.mrf.mxu3  ;;  %v476_v7 = vpop.f32.mrf.mxu2 }
 0x376   :  { %v366_v39 = vadd.f32 %v363_v38, %v188_v37  ;;  %v477_v8 = vadd.f32 %v1388_v40, %v476_v7  ;;  %v698_v37 = vld [vmem:[#allocation12 + $0x10] sm:$0xff]  ;;  %v697_v38 = vld [vmem:[#allocation12 + $0x8] sm:$0xff] }
 0x378   :  { %780 = vtanh.f32 %v366_v39  ;;  %v193_v48 = vpop.f32.mrf.mxu0  ;;  %v696_v39 = vld [vmem:[#allocation12] sm:$0xff] }
 0x379   :  { %v194_v58 = vadd.f32 %v1240_v35, %v193_v48 }
 0x37d   :  { %v530_v43 = vpop.f32.mrf.mxu3 }
 0x37e   :  { %v781_v44 = vpop.eup %780  ;;  %v533_v45 = vadd.f32 %v530_v43, %v465_v42 }
 0x37f   :  { %387 = vmatmul.f32.vlgmr.msrb.gmra.mxu0 %v781_v44  ;;  %478 = vmatmul.f32.gmra.mxu2 %v781_v44 }
 0x380   :  { %782 = vtanh.f32 %v533_v45  ;;  %605 = vmatpush.msrb.mxu0 %v1252_v11  ;;  %v769_v45 = vld [vmem:[%s1446_s8] ss:$0 sm:$0xff] }
 0x382   :  { %606 = vmatpush.msrb.mxu0 %v1254_v12 }
 0x384   :  { %607 = vmatpush.msrb.mxu0 %v1258_v13 }
 0x386   :  { %v783_v46 = vpop.eup %782  ;;  %608 = vmatpush.msrb.mxu0 %v1264_v14 }
 0x387   :  { %552 = vmatmul.f32.vlgmr.msra.gmra.mxu0 %v783_v46 }
 0x388   :  { %609 = vmatpush.msrb.mxu0 %v1270_v15 }
 0x38a   :  { %610 = vmatpush.msrb.mxu0 %v1277_v16 }
 0x38c   :  { %611 = vmatpush.msrb.mxu0 %v1290_v17 }
 0x38e   :  { %612 = vmatpush.msrb.mxu0 %v1296_v18 }
 0x390   :  { %613 = vmatpush.msrb.mxu0 %v1300_v19 }
 0x392   :  { %614 = vmatpush.msrb.mxu0 %v1305_v20 }
 0x394   :  { %615 = vmatpush.msrb.mxu0 %v1308_v21 }
 0x396   :  { %616 = vmatpush.msrb.mxu0 %v1318_v22 }
 0x398   :  { %617 = vmatpush.msrb.mxu0 %v1324_v23 }
 0x39a   :  { %618 = vmatpush.msrb.mxu0 %v1326_v24 }
 0x39c   :  { %619 = vmatpush.msrb.mxu0 %v1331_v26 }
 0x39e   :  { %620 = vmatpush.msrb.mxu0 %v1341_v27 }
 0x3fc   :  { %v388_v50 = vpop.f32.mrf.mxu0 }
 0x3fd   :  { %v391_v51 = vadd.f32 %v388_v50, %v191_v49 }
 0x3ff   :  { %784 = vtanh.f32 %v391_v51 }
 0x404   :  { %v553_v54 = vpop.f32.mrf.mxu0 }
 0x405   :  { %v785_v55 = vpop.eup %784  ;;  %v556_v56 = vadd.f32 %v553_v54, %v468_v53 }
 0x406   :  { %412 = vmatmul.f32.vlgmr.msra.gmra.mxu1 %v785_v55  ;;  %481 = vmatmul.f32.gmra.mxu2 %v785_v55 }
 0x407   :  { %786 = vtanh.f32 %v556_v56  ;;  %628 = vmatpush.msra.mxu1 %v1252_v11 }
 0x409   :  { %629 = vmatpush.msra.mxu1 %v1254_v12  ;;  %v479_v12 = vpop.f32.mrf.mxu2 }
 0x40b   :  { %630 = vmatpush.msra.mxu1 %v1258_v13  ;;  %v480_v13 = vadd.f32 %v1388_v40, %v479_v12 }
 0x40d   :  { %v787_v57 = vpop.eup %786  ;;  %631 = vmatpush.msra.mxu1 %v1264_v14 }
 0x40e   :  { %575 = vmatmul.f32.vlgmr.msrb.gmra.mxu1 %v787_v57 }
 0x40f   :  { %632 = vmatpush.msra.mxu1 %v1270_v15 }
 0x411   :  { %633 = vmatpush.msra.mxu1 %v1277_v16 }
 0x413   :  { %634 = vmatpush.msra.mxu1 %v1290_v17  ;;  %v711_v17 = vld [vmem:[#allocation12 + $0x78] sm:$0xff] }
 0x414   :  { %716 = vmatpush.msra.mxu0 %v711_v17 }
 0x415   :  { %635 = vmatpush.msra.mxu1 %v1296_v18  ;;  %v710_v18 = vld [vmem:[#allocation12 + $0x70] sm:$0xff] }
 0x416   :  { %717 = vmatpush.msra.mxu0 %v710_v18 }
 0x417   :  { %636 = vmatpush.msra.mxu1 %v1300_v19  ;;  %v709_v19 = vld [vmem:[#allocation12 + $0x68] sm:$0xff] }
 0x418   :  { %718 = vmatpush.msra.mxu0 %v709_v19 }
 0x419   :  { %637 = vmatpush.msra.mxu1 %v1305_v20  ;;  %v708_v20 = vld [vmem:[#allocation12 + $0x60] sm:$0xff] }
 0x41a   :  { %719 = vmatpush.msra.mxu0 %v708_v20 }
 0x41b   :  { %638 = vmatpush.msra.mxu1 %v1308_v21 }
 0x41d   :  { %639 = vmatpush.msra.mxu1 %v1318_v22  ;;  %v707_v22 = vld [vmem:[#allocation12 + $0x58] sm:$0xff] }
 0x41e   :  { %720 = vmatpush.msra.mxu0 %v707_v22 }
 0x41f   :  { %640 = vmatpush.msra.mxu1 %v1324_v23  ;;  %v706_v23 = vld [vmem:[#allocation12 + $0x50] sm:$0xff] }
 0x420   :  { %721 = vmatpush.msra.mxu0 %v706_v23 }
 0x421   :  { %641 = vmatpush.msra.mxu1 %v1326_v24  ;;  %v705_v24 = vld [vmem:[#allocation12 + $0x48] sm:$0xff] }
 0x422   :  { %722 = vmatpush.msra.mxu0 %v705_v24 }
 0x423   :  { %642 = vmatpush.msra.mxu1 %v1331_v26 }
 0x424   :  { %723 = vmatpush.msra.mxu0 %v704_v25 }
 0x425   :  { %643 = vmatpush.msra.mxu1 %v1341_v27  ;;  %v703_v27 = vld [vmem:[#allocation12 + $0x38] sm:$0xff] }
 0x426   :  { %724 = vmatpush.msra.mxu0 %v703_v27 }
 0x428   :  { %725 = vmatpush.msra.mxu0 %v702_v28 }
 0x42a   :  { %726 = vmatpush.msra.mxu0 %v701_v29 }
 0x42c   :  { %727 = vmatpush.msra.mxu0 %v700_v33 }
 0x42e   :  { %728 = vmatpush.msra.mxu0 %v699_v36 }
 0x430   :  { %729 = vmatpush.msra.mxu0 %v698_v37 }
 0x432   :  { %730 = vmatpush.msra.mxu0 %v697_v38 }
 0x434   :  { %731 = vmatpush.msra.mxu0 %v696_v39 }
 0x483   :  { %v413_v59 = vpop.f32.mrf.mxu1 }
 0x484   :  { %v416_v60 = vadd.f32 %v413_v59, %v194_v58 }
 0x486   :  { %788 = vtanh.f32 %v416_v60 }
 0x489   :  { %v482_v21 = vpop.f32.mrf.mxu2 }
 0x48a   :  { %v483_v30 = vadd.f32 %v1388_v40, %v482_v21 }
 0x48b   :  { %v576_v63 = vpop.f32.mrf.mxu1 }
 0x48c   :  { %v789_v0 = vpop.eup %788  ;;  %v579_v1 = vadd.f32 %v576_v63, %v471_v62 }
 0x48d   :  { %484 = vmatmul.f32.gmra.mxu2 %v789_v0 }
 0x48e   :  { %790 = vtanh.f32 %v579_v1 }
 0x494   :  { %v791_v2 = vpop.eup %790 }
 0x495   :  { %598 = vmatmul.f32.vlgmr.msrb.gmra.mxu3 %v791_v2 }
 0x510   :  { %v485_v26 = vpop.f32.mrf.mxu2 }
 0x511   :  { %v486_v41 = vadd.f32 %v1388_v40, %v485_v26 }
 0x518   :  { %v599_v5 = vpop.f32.mrf.mxu3 }
 0x519   :  { %v602_v6 = vadd.f32 %v599_v5, %v474_v4 }
 0x51b   :  { %792 = vtanh.f32 %v602_v6 }
 0x521   :  { %v793_v35 = vpop.eup %792 }
 0x522   :  { %621 = vmatmul.f32.vlgmr.msrb.gmra.mxu0 %v793_v35 }
 0x59f   :  { %v622_v9 = vpop.f32.mrf.mxu0 }
 0x5a0   :  { %v625_v10 = vadd.f32 %v622_v9, %v477_v8 }
 0x5a2   :  { %794 = vtanh.f32 %v625_v10 }
 0x5a8   :  { %v795_v11 = vpop.eup %794 }
 0x5a9   :  { %644 = vmatmul.f32.vlgmr.msra.gmra.mxu1 %v795_v11 }
 0x626   :  { %v645_v14 = vpop.f32.mrf.mxu1 }
 0x627   :  { %v648_v15 = vadd.f32 %v645_v14, %v480_v13 }
 0x629   :  { %796 = vtanh.f32 %v648_v15 }
 0x62f   :  { %v797_v16 = vpop.eup %796 }
 0x630   :  { %667 = vmatmul.f32.vlgmr.msrb.gmra.mxu2 %v797_v16 }
 0x6b3   :  { %v668_v31 = vpop.f32.mrf.mxu2 }
 0x6b4   :  { %v671_v32 = vadd.f32 %v668_v31, %v483_v30 }
 0x6b6   :  { %798 = vtanh.f32 %v671_v32 }
 0x6bc   :  { %v799_v34 = vpop.eup %798 }
 0x6bd   :  { %690 = vmatmul.f32.vlgmr.msra.gmra.mxu3 %v799_v34 }
 0x740   :  { %v691_v42 = vpop.f32.mrf.mxu3 }
 0x741   :  { %v694_v43 = vadd.f32 %v691_v42, %v486_v41 }
 0x743   :  { %800 = vtanh.f32 %v694_v43 }
 0x749   :  { %v801_v44 = vpop.eup %800 }
 0x74a   :  { %732 = vmatmul.f32.vlgmr.msra.gmra.mxu0 %v801_v44 }
 0x7c7   :  { %v733_v46 = vpop.f32.mrf.mxu0 }
 0x7c8   :  { %v734_v47 = vadd.f32 %v769_v45, %v733_v46 }
 0x7ca   :  { %736 = vst [vmem:[#allocation14] sm:$0xff] %v734_v47 }
 0x7cb   :  { %747 = dma.vmem_to_hbm [thread:$0]  %s743_s19, 128, %s745_s22, [#allocation5]  }
 0x7cc   :  { %978 = dma.done.wait [#allocation5], 128  }
 0x7cd   :  { %979 = vsyncadd [#allocation5], 4294967168 }
 0x7ce   :  { %752 = vsyncpa [#allocation4], 1 }
 0x7cf   :  { %753 = vsyncpa [#allocation7], 1 }
 0x7d0   :  { %754 = vsyncpa [#allocation10], 1 }
 0x7d1   :  { %755 = vsyncpa [#allocation13], 1 }
 0x7d2   :  { %756 = vsyncpa [#allocation5], 1 }

</bundles_post_ra>
